<compile_context>
chip_gen: v7x
topology: tpu7x:2x2x1
jax: 0.10.0
libtpu: 0.0.40
codegen_flags: <defaults>
</compile_context>

<pallas_src>
import functools

import jax
import jax.numpy as jnp
from jax.experimental import pallas as pl
from jax.experimental.pallas import tpu as pltpu


def _round_up(x: int, m: int) -> int:
    return (x + m - 1) // m * m


def fused_conv3x3_stack_kernel(x_ref, w_ref, b_ref, o_ref, *, H, W):
    """Three chained single-channel 3x3 SAME convolutions, fully in registers.

    x_ref : (1, SH, SW) zero-padded input plane (image in top-left HxW), VMEM
    w_ref : (27,)       weights for 3 layers (layer-major, then row-major), SMEM
    b_ref : (3,)        biases, SMEM
    o_ref : (1, SH, SW) lane-dense output slab, VMEM (valid data in top-left HxW)
    """
    _, SH, SW = x_ref.shape
    n_layers = b_ref.shape[0]

    # The padded slab's zero margin (rows >= H, cols >= W) acts as the conv's
    # SAME zero-padding: rolling by +/-1 only ever wraps zeros (never image
    # data) back into the 0..H-1 x 0..W-1 output window.
    h = x_ref[0]

    # Interior mask, used to restore the zero-padding ring between layers.
    rows = jax.lax.broadcasted_iota(jnp.int32, (SH, SW), 0)
    cols = jax.lax.broadcasted_iota(jnp.int32, (SH, SW), 1)
    interior = (rows < H) & (cols < W)

    for layer in range(n_layers):
        base = layer * 9
        # Row-shifted (sublane) copies: row_shift[ki][i, j] == h[i + ki - 1, j].
        # pltpu.roll follows jnp.roll semantics, so shift = (1 - ki) mod SH.
        row_shift = (
            pltpu.roll(h, 1, axis=0),       # ki = 0 -> x[i - 1, j]
            h,                              # ki = 1 -> x[i,     j]
            pltpu.roll(h, SH - 1, axis=0),  # ki = 2 -> x[i + 1, j]
        )
        # Fold center tap and bias into the accumulator init.
        acc = w_ref[base + 4] * h + b_ref[layer]
        for ki in range(3):
            hr = row_shift[ki]
            # Column-shifted (lane) copies: col_shift[kj][i,j] == hr[i, j + kj - 1].
            col_shift = (
                pltpu.roll(hr, 1, axis=1),       # kj = 0 -> x[.., j - 1]
                hr,                              # kj = 1 -> x[.., j]
                pltpu.roll(hr, SW - 1, axis=1),  # kj = 2 -> x[.., j + 1]
            )
            for kj in range(3):
                if ki == 1 and kj == 1:
                    continue  # center tap already in acc
                acc = acc + w_ref[base + ki * 3 + kj] * col_shift[kj]

        if layer + 1 < n_layers:
            # Intermediate activation stays in registers; zero everything
            # outside the image so the next layer sees proper SAME padding.
            h = jnp.where(interior, acc, 0.0)
        else:
            # Final layer: write the full lane-dense slab (unmasked vst).
            # The conv "halo" outside HxW is cropped away in the wrapper.
            o_ref[0] = acc


def fused_conv_stack(x_planes_padded, w_flat, b_flat, H, W):
    """Run the fused 3-layer conv stack on P zero-padded (SH, SW) f32 planes."""
    P, SH, SW = x_planes_padded.shape
    kernel = functools.partial(fused_conv3x3_stack_kernel, H=H, W=W)
    return pl.pallas_call(
        kernel,
        out_shape=jax.ShapeDtypeStruct((P, SH, SW), jnp.float32),
        grid=(P,),
        in_specs=[
            pl.BlockSpec((1, SH, SW), lambda p: (p, 0, 0)),   # padded plane
            pl.BlockSpec(memory_space=pltpu.SMEM),            # 27 weights
            pl.BlockSpec(memory_space=pltpu.SMEM),            # 3 biases
        ],
        out_specs=pl.BlockSpec((1, SH, SW), lambda p: (p, 0, 0)),
        compiler_params=pltpu.CompilerParams(
            dimension_semantics=("parallel",)),
        cost_estimate=pl.CostEstimate(
            flops=P * 3 * 9 * 2 * SH * SW,
            transcendentals=0,
            bytes_accessed=2 * P * SH * SW * 4),
    )(x_planes_padded, w_flat, b_flat)


def init_params(key):
    """Deterministic Conv2d(1,1,3) params for 3 layers (PyTorch-style uniform)."""
    params = []
    bound = 1.0 / 3.0  # 1/sqrt(fan_in) = 1/sqrt(1*3*3)
    for i in range(3):
        kw, kb = jax.random.split(jax.random.fold_in(key, i))
        w = jax.random.uniform(kw, (3, 3), jnp.float32, -bound, bound)
        b = jax.random.uniform(kb, (1,), jnp.float32, -bound, bound)
        params.append((w, b))
    return params


@jax.jit
def model_forward(x_nchw, params):
    """x_nchw: (N, C, H, W) float32 -> (N, C, H, W) float32, C must be 1."""
    N, C, H, W = x_nchw.shape
    # Slab: at least one zero row/col past the image (SAME padding via roll
    # wraparound), rounded up to the f32 vreg tile (8 sublanes x 128 lanes).
    SH = _round_up(H + 1, 8)      # 28 -> 32
    SW = _round_up(W + 1, 128)    # 28 -> 128
    planes = x_nchw.reshape(N * C, H, W).astype(jnp.float32)
    planes_padded = jnp.pad(planes, ((0, 0), (0, SH - H), (0, SW - W)))
    w_flat = jnp.concatenate([w.reshape(-1) for (w, _) in params]).astype(jnp.float32)
    b_flat = jnp.concatenate([b.reshape(-1) for (_, b) in params]).astype(jnp.float32)
    y = fused_conv_stack(planes_padded, w_flat, b_flat, H, W)
    return y[:, :H, :W].reshape(N, C, H, W)


def reference_forward(x_nchw, params):
    """Pure-JAX reference using lax.conv for the correctness check."""
    h = x_nchw.astype(jnp.float32)
    for w, b in params:
        h = jax.lax.conv_general_dilated(
            h, w[None, None], window_strides=(1, 1), padding=((1, 1), (1, 1)),
            dimension_numbers=("NCHW", "OIHW", "NCHW")) + b[0]
    return h


if __name__ == "__main__":
    key = jax.random.PRNGKey(0)
    kx, kp = jax.random.split(key)

    x = jax.random.normal(kx, (1, 1, 28, 28), dtype=jnp.float32)
    params = init_params(kp)

    out = model_forward(x, params)
    out = jax.block_until_ready(out)

    ref = reference_forward(x, params)
    assert out.shape == (1, 1, 28, 28)
    assert jnp.allclose(out, ref, atol=1e-4, rtol=1e-4), float(jnp.max(jnp.abs(out - ref)))

    print("KERNEL_OK")
</pallas_src>

<mosaic_0001>
module attributes {stable_mosaic.version = 11 : i64} {
  func.func @fused_conv3x3_stack_kernel(%arg0: i32, %arg1: memref<1x32x128xf32, #tpu.memory_space<vmem>>, %arg2: memref<27xf32, #tpu.memory_space<smem>>, %arg3: memref<3xf32, #tpu.memory_space<smem>>, %arg4: memref<1x32x128xf32, #tpu.memory_space<vmem>>) attributes {dimension_semantics = [#tpu.dimension_semantics<parallel>], iteration_bounds = array<i64: 1>, scalar_prefetch = 0 : i64, scratch_operands = 0 : i64, tpu.core_type = #tpu.core_type<tc>, window_params = [{transform_indices = @transform_0, window_bounds = array<i64: 1, 32, 128>}, {transform_indices = @transform_1, window_bounds = array<i64: 27>}, {transform_indices = @transform_2, window_bounds = array<i64: 3>}, {transform_indices = @transform_3, window_bounds = array<i64: 1, 32, 128>}]} {
    %c0 = arith.constant 0 : index
    %c0_0 = arith.constant 0 : index
    %c0_1 = arith.constant 0 : index
    %0 = vector.load %arg1[%c0, %c0_0, %c0_1] : memref<1x32x128xf32, #tpu.memory_space<vmem>>, vector<1x32x128xf32>
    %1 = vector.shape_cast %0 : vector<1x32x128xf32> to vector<32x128xf32>
    %2 = tpu.iota {dimensions = array<i32: 0>} : vector<32x128xi32>
    %3 = tpu.iota {dimensions = array<i32: 1>} : vector<32x128xi32>
    %c28_i32 = arith.constant 28 : i32
    %4 = vector.broadcast %c28_i32 : i32 to vector<32x128xi32>
    %5 = arith.cmpi slt, %2, %4 : vector<32x128xi32>
    %c28_i32_2 = arith.constant 28 : i32
    %6 = vector.broadcast %c28_i32_2 : i32 to vector<32x128xi32>
    %7 = arith.cmpi slt, %3, %6 : vector<32x128xi32>
    %8 = arith.andi %5, %7 : vector<32x128xi1>
    %c1_i32 = arith.constant 1 : i32
    %9 = tpu.dynamic_rotate %1 by %c1_i32 dim 0 : vector<32x128xf32>, i32 -> vector<32x128xf32>
    %c31_i32 = arith.constant 31 : i32
    %10 = tpu.dynamic_rotate %1 by %c31_i32 dim 0 : vector<32x128xf32>, i32 -> vector<32x128xf32>
    %c4 = arith.constant 4 : index
    %11 = memref.load %arg2[%c4] : memref<27xf32, #tpu.memory_space<smem>>
    %12 = vector.broadcast %11 : f32 to vector<32x128xf32>
    %13 = arith.mulf %12, %1 : vector<32x128xf32>
    %c0_3 = arith.constant 0 : index
    %14 = memref.load %arg3[%c0_3] : memref<3xf32, #tpu.memory_space<smem>>
    %15 = vector.broadcast %14 : f32 to vector<32x128xf32>
    %16 = arith.addf %13, %15 : vector<32x128xf32>
    %c1_i32_4 = arith.constant 1 : i32
    %17 = tpu.dynamic_rotate %9 by %c1_i32_4 dim 1 : vector<32x128xf32>, i32 -> vector<32x128xf32>
    %c127_i32 = arith.constant 127 : i32
    %18 = tpu.dynamic_rotate %9 by %c127_i32 dim 1 : vector<32x128xf32>, i32 -> vector<32x128xf32>
    %c0_5 = arith.constant 0 : index
    %19 = memref.load %arg2[%c0_5] : memref<27xf32, #tpu.memory_space<smem>>
    %20 = vector.broadcast %19 : f32 to vector<32x128xf32>
    %21 = arith.mulf %20, %17 : vector<32x128xf32>
    %22 = arith.addf %16, %21 : vector<32x128xf32>
    %c1 = arith.constant 1 : index
    %23 = memref.load %arg2[%c1] : memref<27xf32, #tpu.memory_space<smem>>
    %24 = vector.broadcast %23 : f32 to vector<32x128xf32>
    %25 = arith.mulf %24, %9 : vector<32x128xf32>
    %26 = arith.addf %22, %25 : vector<32x128xf32>
    %c2 = arith.constant 2 : index
    %27 = memref.load %arg2[%c2] : memref<27xf32, #tpu.memory_space<smem>>
    %28 = vector.broadcast %27 : f32 to vector<32x128xf32>
    %29 = arith.mulf %28, %18 : vector<32x128xf32>
    %30 = arith.addf %26, %29 : vector<32x128xf32>
    %c1_i32_6 = arith.constant 1 : i32
    %31 = tpu.dynamic_rotate %1 by %c1_i32_6 dim 1 : vector<32x128xf32>, i32 -> vector<32x128xf32>
    %c127_i32_7 = arith.constant 127 : i32
    %32 = tpu.dynamic_rotate %1 by %c127_i32_7 dim 1 : vector<32x128xf32>, i32 -> vector<32x128xf32>
    %c3 = arith.constant 3 : index
    %33 = memref.load %arg2[%c3] : memref<27xf32, #tpu.memory_space<smem>>
    %34 = vector.broadcast %33 : f32 to vector<32x128xf32>
    %35 = arith.mulf %34, %31 : vector<32x128xf32>
    %36 = arith.addf %30, %35 : vector<32x128xf32>
    %c5 = arith.constant 5 : index
    %37 = memref.load %arg2[%c5] : memref<27xf32, #tpu.memory_space<smem>>
    %38 = vector.broadcast %37 : f32 to vector<32x128xf32>
    %39 = arith.mulf %38, %32 : vector<32x128xf32>
    %40 = arith.addf %36, %39 : vector<32x128xf32>
    %c1_i32_8 = arith.constant 1 : i32
    %41 = tpu.dynamic_rotate %10 by %c1_i32_8 dim 1 : vector<32x128xf32>, i32 -> vector<32x128xf32>
    %c127_i32_9 = arith.constant 127 : i32
    %42 = tpu.dynamic_rotate %10 by %c127_i32_9 dim 1 : vector<32x128xf32>, i32 -> vector<32x128xf32>
    %c6 = arith.constant 6 : index
    %43 = memref.load %arg2[%c6] : memref<27xf32, #tpu.memory_space<smem>>
    %44 = vector.broadcast %43 : f32 to vector<32x128xf32>
    %45 = arith.mulf %44, %41 : vector<32x128xf32>
    %46 = arith.addf %40, %45 : vector<32x128xf32>
    %c7 = arith.constant 7 : index
    %47 = memref.load %arg2[%c7] : memref<27xf32, #tpu.memory_space<smem>>
    %48 = vector.broadcast %47 : f32 to vector<32x128xf32>
    %49 = arith.mulf %48, %10 : vector<32x128xf32>
    %50 = arith.addf %46, %49 : vector<32x128xf32>
    %c8 = arith.constant 8 : index
    %51 = memref.load %arg2[%c8] : memref<27xf32, #tpu.memory_space<smem>>
    %52 = vector.broadcast %51 : f32 to vector<32x128xf32>
    %53 = arith.mulf %52, %42 : vector<32x128xf32>
    %54 = arith.addf %50, %53 : vector<32x128xf32>
    %cst = arith.constant 0.000000e+00 : f32
    %55 = vector.broadcast %cst : f32 to vector<32x128xf32>
    %56 = arith.select %8, %54, %55 : vector<32x128xi1>, vector<32x128xf32>
    %c1_i32_10 = arith.constant 1 : i32
    %57 = tpu.dynamic_rotate %56 by %c1_i32_10 dim 0 : vector<32x128xf32>, i32 -> vector<32x128xf32>
    %c31_i32_11 = arith.constant 31 : i32
    %58 = tpu.dynamic_rotate %56 by %c31_i32_11 dim 0 : vector<32x128xf32>, i32 -> vector<32x128xf32>
    %c13 = arith.constant 13 : index
    %59 = memref.load %arg2[%c13] : memref<27xf32, #tpu.memory_space<smem>>
    %60 = vector.broadcast %59 : f32 to vector<32x128xf32>
    %61 = arith.mulf %60, %56 : vector<32x128xf32>
    %c1_12 = arith.constant 1 : index
    %62 = memref.load %arg3[%c1_12] : memref<3xf32, #tpu.memory_space<smem>>
    %63 = vector.broadcast %62 : f32 to vector<32x128xf32>
    %64 = arith.addf %61, %63 : vector<32x128xf32>
    %c1_i32_13 = arith.constant 1 : i32
    %65 = tpu.dynamic_rotate %57 by %c1_i32_13 dim 1 : vector<32x128xf32>, i32 -> vector<32x128xf32>
    %c127_i32_14 = arith.constant 127 : i32
    %66 = tpu.dynamic_rotate %57 by %c127_i32_14 dim 1 : vector<32x128xf32>, i32 -> vector<32x128xf32>
    %c9 = arith.constant 9 : index
    %67 = memref.load %arg2[%c9] : memref<27xf32, #tpu.memory_space<smem>>
    %68 = vector.broadcast %67 : f32 to vector<32x128xf32>
    %69 = arith.mulf %68, %65 : vector<32x128xf32>
    %70 = arith.addf %64, %69 : vector<32x128xf32>
    %c10 = arith.constant 10 : index
    %71 = memref.load %arg2[%c10] : memref<27xf32, #tpu.memory_space<smem>>
    %72 = vector.broadcast %71 : f32 to vector<32x128xf32>
    %73 = arith.mulf %72, %57 : vector<32x128xf32>
    %74 = arith.addf %70, %73 : vector<32x128xf32>
    %c11 = arith.constant 11 : index
    %75 = memref.load %arg2[%c11] : memref<27xf32, #tpu.memory_space<smem>>
    %76 = vector.broadcast %75 : f32 to vector<32x128xf32>
    %77 = arith.mulf %76, %66 : vector<32x128xf32>
    %78 = arith.addf %74, %77 : vector<32x128xf32>
    %c1_i32_15 = arith.constant 1 : i32
    %79 = tpu.dynamic_rotate %56 by %c1_i32_15 dim 1 : vector<32x128xf32>, i32 -> vector<32x128xf32>
    %c127_i32_16 = arith.constant 127 : i32
    %80 = tpu.dynamic_rotate %56 by %c127_i32_16 dim 1 : vector<32x128xf32>, i32 -> vector<32x128xf32>
    %c12 = arith.constant 12 : index
    %81 = memref.load %arg2[%c12] : memref<27xf32, #tpu.memory_space<smem>>
    %82 = vector.broadcast %81 : f32 to vector<32x128xf32>
    %83 = arith.mulf %82, %79 : vector<32x128xf32>
    %84 = arith.addf %78, %83 : vector<32x128xf32>
    %c14 = arith.constant 14 : index
    %85 = memref.load %arg2[%c14] : memref<27xf32, #tpu.memory_space<smem>>
    %86 = vector.broadcast %85 : f32 to vector<32x128xf32>
    %87 = arith.mulf %86, %80 : vector<32x128xf32>
    %88 = arith.addf %84, %87 : vector<32x128xf32>
    %c1_i32_17 = arith.constant 1 : i32
    %89 = tpu.dynamic_rotate %58 by %c1_i32_17 dim 1 : vector<32x128xf32>, i32 -> vector<32x128xf32>
    %c127_i32_18 = arith.constant 127 : i32
    %90 = tpu.dynamic_rotate %58 by %c127_i32_18 dim 1 : vector<32x128xf32>, i32 -> vector<32x128xf32>
    %c15 = arith.constant 15 : index
    %91 = memref.load %arg2[%c15] : memref<27xf32, #tpu.memory_space<smem>>
    %92 = vector.broadcast %91 : f32 to vector<32x128xf32>
    %93 = arith.mulf %92, %89 : vector<32x128xf32>
    %94 = arith.addf %88, %93 : vector<32x128xf32>
    %c16 = arith.constant 16 : index
    %95 = memref.load %arg2[%c16] : memref<27xf32, #tpu.memory_space<smem>>
    %96 = vector.broadcast %95 : f32 to vector<32x128xf32>
    %97 = arith.mulf %96, %58 : vector<32x128xf32>
    %98 = arith.addf %94, %97 : vector<32x128xf32>
    %c17 = arith.constant 17 : index
    %99 = memref.load %arg2[%c17] : memref<27xf32, #tpu.memory_space<smem>>
    %100 = vector.broadcast %99 : f32 to vector<32x128xf32>
    %101 = arith.mulf %100, %90 : vector<32x128xf32>
    %102 = arith.addf %98, %101 : vector<32x128xf32>
    %cst_19 = arith.constant 0.000000e+00 : f32
    %103 = vector.broadcast %cst_19 : f32 to vector<32x128xf32>
    %104 = arith.select %8, %102, %103 : vector<32x128xi1>, vector<32x128xf32>
    %c1_i32_20 = arith.constant 1 : i32
    %105 = tpu.dynamic_rotate %104 by %c1_i32_20 dim 0 : vector<32x128xf32>, i32 -> vector<32x128xf32>
    %c31_i32_21 = arith.constant 31 : i32
    %106 = tpu.dynamic_rotate %104 by %c31_i32_21 dim 0 : vector<32x128xf32>, i32 -> vector<32x128xf32>
    %c22 = arith.constant 22 : index
    %107 = memref.load %arg2[%c22] : memref<27xf32, #tpu.memory_space<smem>>
    %108 = vector.broadcast %107 : f32 to vector<32x128xf32>
    %109 = arith.mulf %108, %104 : vector<32x128xf32>
    %c2_22 = arith.constant 2 : index
    %110 = memref.load %arg3[%c2_22] : memref<3xf32, #tpu.memory_space<smem>>
    %111 = vector.broadcast %110 : f32 to vector<32x128xf32>
    %112 = arith.addf %109, %111 : vector<32x128xf32>
    %c1_i32_23 = arith.constant 1 : i32
    %113 = tpu.dynamic_rotate %105 by %c1_i32_23 dim 1 : vector<32x128xf32>, i32 -> vector<32x128xf32>
    %c127_i32_24 = arith.constant 127 : i32
    %114 = tpu.dynamic_rotate %105 by %c127_i32_24 dim 1 : vector<32x128xf32>, i32 -> vector<32x128xf32>
    %c18 = arith.constant 18 : index
    %115 = memref.load %arg2[%c18] : memref<27xf32, #tpu.memory_space<smem>>
    %116 = vector.broadcast %115 : f32 to vector<32x128xf32>
    %117 = arith.mulf %116, %113 : vector<32x128xf32>
    %118 = arith.addf %112, %117 : vector<32x128xf32>
    %c19 = arith.constant 19 : index
    %119 = memref.load %arg2[%c19] : memref<27xf32, #tpu.memory_space<smem>>
    %120 = vector.broadcast %119 : f32 to vector<32x128xf32>
    %121 = arith.mulf %120, %105 : vector<32x128xf32>
    %122 = arith.addf %118, %121 : vector<32x128xf32>
    %c20 = arith.constant 20 : index
    %123 = memref.load %arg2[%c20] : memref<27xf32, #tpu.memory_space<smem>>
    %124 = vector.broadcast %123 : f32 to vector<32x128xf32>
    %125 = arith.mulf %124, %114 : vector<32x128xf32>
    %126 = arith.addf %122, %125 : vector<32x128xf32>
    %c1_i32_25 = arith.constant 1 : i32
    %127 = tpu.dynamic_rotate %104 by %c1_i32_25 dim 1 : vector<32x128xf32>, i32 -> vector<32x128xf32>
    %c127_i32_26 = arith.constant 127 : i32
    %128 = tpu.dynamic_rotate %104 by %c127_i32_26 dim 1 : vector<32x128xf32>, i32 -> vector<32x128xf32>
    %c21 = arith.constant 21 : index
    %129 = memref.load %arg2[%c21] : memref<27xf32, #tpu.memory_space<smem>>
    %130 = vector.broadcast %129 : f32 to vector<32x128xf32>
    %131 = arith.mulf %130, %127 : vector<32x128xf32>
    %132 = arith.addf %126, %131 : vector<32x128xf32>
    %c23 = arith.constant 23 : index
    %133 = memref.load %arg2[%c23] : memref<27xf32, #tpu.memory_space<smem>>
    %134 = vector.broadcast %133 : f32 to vector<32x128xf32>
    %135 = arith.mulf %134, %128 : vector<32x128xf32>
    %136 = arith.addf %132, %135 : vector<32x128xf32>
    %c1_i32_27 = arith.constant 1 : i32
    %137 = tpu.dynamic_rotate %106 by %c1_i32_27 dim 1 : vector<32x128xf32>, i32 -> vector<32x128xf32>
    %c127_i32_28 = arith.constant 127 : i32
    %138 = tpu.dynamic_rotate %106 by %c127_i32_28 dim 1 : vector<32x128xf32>, i32 -> vector<32x128xf32>
    %c24 = arith.constant 24 : index
    %139 = memref.load %arg2[%c24] : memref<27xf32, #tpu.memory_space<smem>>
    %140 = vector.broadcast %139 : f32 to vector<32x128xf32>
    %141 = arith.mulf %140, %137 : vector<32x128xf32>
    %142 = arith.addf %136, %141 : vector<32x128xf32>
    %c25 = arith.constant 25 : index
    %143 = memref.load %arg2[%c25] : memref<27xf32, #tpu.memory_space<smem>>
    %144 = vector.broadcast %143 : f32 to vector<32x128xf32>
    %145 = arith.mulf %144, %106 : vector<32x128xf32>
    %146 = arith.addf %142, %145 : vector<32x128xf32>
    %c26 = arith.constant 26 : index
    %147 = memref.load %arg2[%c26] : memref<27xf32, #tpu.memory_space<smem>>
    %148 = vector.broadcast %147 : f32 to vector<32x128xf32>
    %149 = arith.mulf %148, %138 : vector<32x128xf32>
    %150 = arith.addf %146, %149 : vector<32x128xf32>
    %c0_29 = arith.constant 0 : index
    %c0_30 = arith.constant 0 : index
    %c0_31 = arith.constant 0 : index
    %151 = vector.load %arg4[%c0_29, %c0_30, %c0_31] : memref<1x32x128xf32, #tpu.memory_space<vmem>>, vector<1x32x128xf32>
    %152 = vector.shape_cast %151 : vector<1x32x128xf32> to vector<32x128xf32>
    %153 = vector.shape_cast %150 : vector<32x128xf32> to vector<1x32x128xf32>
    tpu.vector_store %arg4[%c0_29, %c0_30, %c0_31], %153 {strides = array<i32>} : memref<1x32x128xf32, #tpu.memory_space<vmem>>, vector<1x32x128xf32>,
    return
  }
  func.func @transform_0(%arg0: i32) -> (i32, i32, i32) {
    %c0_i32 = arith.constant 0 : i32
    %c0_i32_0 = arith.constant 0 : i32
    %c0_i32_1 = arith.constant 0 : i32
    return %arg0, %c0_i32, %c0_i32_0 : i32, i32, i32
  }
  func.func @transform_1(%arg0: i32) -> i32 {
    %c0_i32 = arith.constant 0 : i32
    %c0_i32_0 = arith.constant 0 : i32
    return %c0_i32 : i32
  }
  func.func @transform_2(%arg0: i32) -> i32 {
    %c0_i32 = arith.constant 0 : i32
    %c0_i32_0 = arith.constant 0 : i32
    return %c0_i32 : i32
  }
  func.func @transform_3(%arg0: i32) -> (i32, i32, i32) {
    %c0_i32 = arith.constant 0 : i32
    %c0_i32_0 = arith.constant 0 : i32
    %c0_i32_1 = arith.constant 0 : i32
    return %arg0, %c0_i32, %c0_i32_0 : i32, i32, i32
  }
}

</mosaic_0001>

<bundles_post_ra>
// kernel: model_forward.1
= control target key start
LH: loop header
LB: loop body
LE: loop exit
PB: predicated region body
PF: predicated region fallthrough
CT: control target
= control target key end

     0   :  { %8 = vsyncpa [#allocation3], 0  ;;  %s941_s0 = inlined_call_operand.vmem [shape: f32[1,32,128], index: 0, kind: input, shape index: {}]   ;;  %s942_s1 = inlined_call_operand.vmem [shape: f32[27], index: 1, kind: input, shape index: {}]   ;;  %s943_s2 = inlined_call_operand.vmem [shape: f32[3], index: 2, kind: input, shape index: {}]   ;;  %s944_s3 = inlined_call_operand.vmem [shape: f32[1,32,128], index: 3, kind: output, shape index: {}]  }
   0x1   :  { %s18_s14 = sshll.u32 %s942_s1, 4  ;;  %s19_s14 = int_to_ptr.vmem [resolvable:$true] %s18_s14 }
   0x2   :  { %9 = vsyncpa [#allocation5], 0  ;;  %s28_s17 = sshll.u32 %s943_s2, 4  ;;  %s579_s18 = scalar_lea.vmem %s19_s14, 16  ;;  %s29_s17 = int_to_ptr.vmem [resolvable:$true] %s28_s17 }
   0x3   :  { %p580_p0 = scmp.ne.s32.totalorder %s19_s14, %s579_s18  ;;  %p584_p1 = scmp.lt.s32.totalorder %s19_s14, %s19_s14 }
   0x4   :  { %p585_p2 = scmp.lt.s32.totalorder %s579_s18, %s579_s18 }
   0x6   :  { %p586_p3 = por %p585_p2, %p584_p1 }
   0x8   :  { %p587_p4 = pnand %p586_p3, %p580_p0 }
   0xa   :  { %590 = shalt.err (!%p587_p4)
}
   0xb   :  { %s607_s19 = smov [#allocation2]   ;;  %s591_s20 = scalar_lea.vmem %s29_s17, 16 }
   0xc   :  { %21 = dma.vmem_to_smem %s19_s14, 16, %s607_s19, [#allocation3]  }
   0xd   :  { %p592_p5 = scmp.ne.s32.totalorder %s29_s17, %s591_s20  ;;  %p596_p6 = scmp.lt.s32.totalorder %s29_s17, %s29_s17 }
   0xe   :  { %p597_p7 = scmp.lt.s32.totalorder %s591_s20, %s591_s20 }
  0x10   :  { %p598_p8 = por %p597_p7, %p596_p6 }
  0x12   :  { %p599_p9 = pnand %p598_p8, %p592_p5 }
  0x14   :  { %602 = shalt.err (!%p599_p9)
}
  0x15   :  { %s608_s1 = smov [#allocation4]  }
  0x16   :  { %31 = dma.vmem_to_smem %s29_s17, 16, %s608_s1, [#allocation5]  }
  0x17   :  { %603 = dma.done.wait [#allocation3], 16  }
  0x18   :  { %604 = vsyncadd [#allocation3], 4294967280 }
  0x19   :  { %605 = dma.done.wait [#allocation5], 16  }
  0x1a   :  { %606 = vsyncadd [#allocation5], 4294967280 }
  0x1b   :  { %38 = sfence }
  0x1c   :  { %v640_v0 = vld [vmem:[%s941_s0 + $0x8] sm:$0xff]  ;;  %v41_v1 = vld [vmem:[%s941_s0 + $0x10] sm:$0xff]  ;;  %v43_v2 = vlaneseq  ;;  %v39_v3 = vld [vmem:[%s941_s0] sm:$0xff]  ;;  %s609_s28 = smov 1   ;;  %s547_s29 = sld [smem:[#allocation2 + $0x4]] }
  0x1d   :  { %v60_v4 = vrot.slane %v640_v0, 7  ;;  %v61_v5 = vrot.slane %v41_v1, 7  ;;  %v42_v6 = vld [vmem:[%s941_s0 + $0x18] sm:$0xff]  ;;  %v59_v7 = vrot.slane %v39_v3, 7  ;;  %s610_s0 = smov 127   ;;  %v69_v14 = vrot.slane %v640_v0, 1 }
  0x1e   :  { %v653_v8 = vshrl.u32 %v43_v2, 7  ;;  %v62_v9 = vrot.slane %v42_v6, 7  ;;  %v70_v15 = vrot.slane %v41_v1, 1  ;;  %v68_v16 = vrot.slane %v39_v3, 1  ;;  %s83_s30 = sld [smem:[#allocation4]]  ;;  %s548_s4 = sld [smem:[#allocation2 + $0x1]] }
  0x1f   :  { %v71_v19 = vrot.slane %v42_v6, 1  ;;  %s105_s5 = sld [smem:[#allocation2]]  ;;  %s549_s6 = sld [smem:[#allocation2 + $0x2]] }
  0x20   :  { %vm63_vm0 = vcmp.lt.s32.totalorder %v653_v8, 1  ;;  %vm72_vm1 = vcmp.lt.s32.totalorder %v653_v8, 7  ;;  %s550_s7 = sld [smem:[#allocation2 + $0x3]]  ;;  %s551_s8 = sld [smem:[#allocation2 + $0x5]] }
  0x21   :  { %v65_v10 = vsel %vm63_vm0, %v60_v4, %v61_v5  ;;  %v67_v11 = vsel %vm63_vm0, %v62_v9, %v59_v7  ;;  %v64_v12 = vsel %vm63_vm0, %v61_v5, %v62_v9  ;;  %v66_v13 = vsel %vm63_vm0, %v59_v7, %v60_v4  ;;  %s553_s9 = sld [smem:[#allocation2 + $0x7]]  ;;  %s552_s10 = sld [smem:[#allocation2 + $0x6]] }
  0x22   :  { %93 = vrot.lane.b32.xlu1 %v65_v10, %s609_s28  ;;  %89 = vrot.lane.b32.xlu0 %v67_v11, %s609_s28  ;;  %v686_v17 = vsel %vm72_vm1, %v69_v14, %v70_v15  ;;  %v690_v18 = vsel %vm72_vm1, %v68_v16, %v69_v14  ;;  %v698_v20 = vsel %vm72_vm1, %v71_v19, %v68_v16  ;;  %v78_v22 = vstv %s547_s29  ;;  %s554_s11 = sld [smem:[#allocation2 + $0x8]]  ;;  %s555_s12 = sld [smem:[#allocation2 + $0xd]] }
  0x23   :  { %v702_v21 = vsel %vm72_vm1, %v70_v15, %v71_v19  ;;  %v81_v23 = vmul.f32 %v78_v22, %v41_v1  ;;  %v79_v24 = vmul.f32 %v78_v22, %v39_v3  ;;  %v82_v30 = vmul.f32 %v78_v22, %v42_v6  ;;  %s556_s13 = sld [smem:[#allocation4 + $0x1]]  ;;  %s558_s15 = sld [smem:[#allocation2 + $0xa]] }
  0x24   :  { %v84_v25 = vstv %s83_s30  ;;  %v116_v26 = vstv %s548_s4  ;;  %v80_v31 = vmul.f32 %v78_v22, %v640_v0  ;;  %s557_s14 = sld [smem:[#allocation2 + $0x9]]  ;;  %s559_s16 = sld [smem:[#allocation2 + $0xb]] }
  0x25   :  { %v106_v27 = vstv %s105_s5  ;;  %v87_v28 = vadd.f32 %v84_v25, %v81_v23  ;;  %v85_v29 = vadd.f32 %v84_v25, %v79_v24  ;;  %v119_v34 = vmul.f32 %v116_v26, %v65_v10  ;;  %s560_s17 = sld [smem:[#allocation2 + $0xc]]  ;;  %s561_s18 = sld [smem:[#allocation2 + $0xe]] }
  0x26   :  { %95 = vrot.lane.b32.xlu1 %v64_v12, %s609_s28  ;;  %91 = vrot.lane.b32.xlu0 %v66_v13, %s609_s28  ;;  %v117_v35 = vmul.f32 %v116_v26, %v67_v11  ;;  %v88_v40 = vadd.f32 %v84_v25, %v82_v30  ;;  %v86_v41 = vadd.f32 %v84_v25, %v80_v31  ;;  %v126_v62 = vstv %s549_s6  ;;  %s562_s19 = sld [smem:[#allocation2 + $0xf]]  ;;  %s563_s20 = sld [smem:[#allocation2 + $0x10]] }
  0x27   :  { %v120_v42 = vmul.f32 %v116_v26, %v64_v12  ;;  %v118_v43 = vmul.f32 %v116_v26, %v66_v13  ;;  %v152_v63 = vstv %s550_s7  ;;  %v162_v5 = vstv %s551_s8  ;;  %s564_s1 = sld [smem:[#allocation2 + $0x11]]  ;;  %s565_s2 = sld [smem:[#allocation2 + $0x16]] }
  0x28   :  { %v198_v9 = vstv %s553_s9  ;;  %v188_v24 = vstv %s552_s10  ;;  %s566_s21 = sld [smem:[#allocation4 + $0x2]]  ;;  %s568_s23 = sld [smem:[#allocation2 + $0x13]] }
  0x29   :  { %v200_v25 = vmul.f32 %v198_v9, %v686_v17  ;;  %v199_v26 = vmul.f32 %v198_v9, %v690_v18  ;;  %s567_s22 = sld [smem:[#allocation2 + $0x12]]  ;;  %s569_s24 = sld [smem:[#allocation2 + $0x14]] }
  0x2a   :  { %99 = vrot.lane.b32.xlu1 %v66_v13, %s610_s0  ;;  %97 = vrot.lane.b32.xlu0 %v67_v11, %s610_s0  ;;  %s570_s25 = sld [smem:[#allocation2 + $0x15]]  ;;  %s571_s26 = sld [smem:[#allocation2 + $0x17]] }
  0x2b   :  { %s572_s27 = sld [smem:[#allocation2 + $0x18]] }
  0x2e   :  { %103 = vrot.lane.b32.xlu1 %v64_v12, %s610_s0  ;;  %101 = vrot.lane.b32.xlu0 %v65_v10, %s610_s0 }
  0x32   :  { %137 = vrot.lane.b32.xlu1 %v640_v0, %s609_s28  ;;  %135 = vrot.lane.b32.xlu0 %v39_v3, %s609_s28 }
  0x36   :  { %141 = vrot.lane.b32.xlu1 %v42_v6, %s609_s28  ;;  %139 = vrot.lane.b32.xlu0 %v41_v1, %s609_s28 }
  0x3a   :  { %145 = vrot.lane.b32.xlu1 %v640_v0, %s610_s0  ;;  %143 = vrot.lane.b32.xlu0 %v39_v3, %s610_s0 }
  0x3e   :  { %149 = vrot.lane.b32.xlu1 %v42_v6, %s610_s0  ;;  %147 = vrot.lane.b32.xlu0 %v41_v1, %s610_s0 }
  0x42   :  { %173 = vrot.lane.b32.xlu1 %v686_v17, %s609_s28  ;;  %171 = vrot.lane.b32.xlu0 %v690_v18, %s609_s28 }
  0x46   :  { %177 = vrot.lane.b32.xlu1 %v698_v20, %s609_s28  ;;  %175 = vrot.lane.b32.xlu0 %v702_v21, %s609_s28 }
  0x4a   :  { %181 = vrot.lane.b32.xlu1 %v686_v17, %s610_s0  ;;  %179 = vrot.lane.b32.xlu0 %v690_v18, %s610_s0  ;;  %v202_v17 = vmul.f32 %v198_v9, %v698_v20  ;;  %v201_v18 = vmul.f32 %v198_v9, %v702_v21 }
  0x4e   :  { %185 = vrot.lane.b32.xlu1 %v698_v20, %s610_s0  ;;  %183 = vrot.lane.b32.xlu0 %v702_v21, %s610_s0 }
  0x94   :  { %v94_v32 = vpop.permute.xlu1 %93  ;;  %v90_v33 = vpop.permute.xlu0 %89 }
  0x95   :  { %v109_v36 = vmul.f32 %v106_v27, %v94_v32  ;;  %v107_v37 = vmul.f32 %v106_v27, %v90_v33 }
  0x97   :  { %v113_v38 = vadd.f32 %v109_v36, %v87_v28  ;;  %v111_v39 = vadd.f32 %v107_v37, %v85_v29 }
  0x98   :  { %v96_v44 = vpop.permute.xlu1 %95  ;;  %v92_v45 = vpop.permute.xlu0 %91 }
  0x99   :  { %v110_v46 = vmul.f32 %v106_v27, %v96_v44  ;;  %v108_v47 = vmul.f32 %v106_v27, %v92_v45  ;;  %v121_v48 = vadd.f32 %v117_v35, %v111_v39  ;;  %v123_v49 = vadd.f32 %v119_v34, %v113_v38 }
  0x9b   :  { %v114_v50 = vadd.f32 %v110_v46, %v88_v40  ;;  %v112_v51 = vadd.f32 %v108_v47, %v86_v41 }
  0x9c   :  { %v100_v52 = vpop.permute.xlu1 %99  ;;  %v98_v53 = vpop.permute.xlu0 %97 }
  0x9d   :  { %v122_v54 = vadd.f32 %v118_v43, %v112_v51  ;;  %v124_v55 = vadd.f32 %v120_v42, %v114_v50  ;;  %v128_v3 = vmul.f32 %v126_v62, %v100_v52  ;;  %v127_v4 = vmul.f32 %v126_v62, %v98_v53 }
  0x9e   :  { %v722_v51 = vand.u32 127, %v43_v2  ;;  %v208_v52 = vstv %s554_s11 }
  0x9f   :  { %v132_v14 = vadd.f32 %v128_v3, %v122_v54  ;;  %v131_v15 = vadd.f32 %v127_v4, %v121_v48 }
  0xa0   :  { %v104_v56 = vpop.permute.xlu1 %103  ;;  %v102_v57 = vpop.permute.xlu0 %101  ;;  %vm54_vm2 = vcmp.lt.s32.totalorder %v722_v51, 28 }
  0xa1   :  { %v130_v10 = vmul.f32 %v126_v62, %v104_v56  ;;  %v129_v11 = vmul.f32 %v126_v62, %v102_v57 }
  0xa3   :  { %v134_v29 = vadd.f32 %v130_v10, %v124_v55  ;;  %v133_v30 = vadd.f32 %v129_v11, %v123_v49  ;;  %v47_v55 = vadd.s32 24, %v653_v8 }
  0xa4   :  { %v138_v58 = vpop.permute.xlu1 %137  ;;  %v136_v59 = vpop.permute.xlu0 %135 }
  0xa5   :  { %v154_v6 = vmul.f32 %v152_v63, %v138_v58  ;;  %v153_v7 = vmul.f32 %v152_v63, %v136_v59  ;;  %vm53_vm3 = vcmp.lt.s32.totalorder %v47_v55, 28 }
  0xa6   :  { %vm734_vm4 = vmand %vm53_vm3, %vm54_vm2 }
  0xa7   :  { %v158_v27 = vadd.f32 %v154_v6, %v132_v14  ;;  %v157_v28 = vadd.f32 %v153_v7, %v131_v15 }
  0xa8   :  { %v142_v60 = vpop.permute.xlu1 %141  ;;  %v140_v61 = vpop.permute.xlu0 %139 }
  0xa9   :  { %v156_v22 = vmul.f32 %v152_v63, %v142_v60  ;;  %v155_v23 = vmul.f32 %v152_v63, %v140_v61 }
  0xab   :  { %v160_v39 = vadd.f32 %v156_v22, %v134_v29  ;;  %v159_v40 = vadd.f32 %v155_v23, %v133_v30 }
  0xac   :  { %v146_v0 = vpop.permute.xlu1 %145  ;;  %v144_v1 = vpop.permute.xlu0 %143 }
  0xad   :  { %v164_v16 = vmul.f32 %v162_v5, %v146_v0  ;;  %v163_v19 = vmul.f32 %v162_v5, %v144_v1 }
  0xaf   :  { %v168_v35 = vadd.f32 %v164_v16, %v158_v27  ;;  %v167_v36 = vadd.f32 %v163_v19, %v157_v28 }
  0xb0   :  { %v150_v12 = vpop.permute.xlu1 %149  ;;  %v148_v13 = vpop.permute.xlu0 %147 }
  0xb1   :  { %v166_v31 = vmul.f32 %v162_v5, %v150_v12  ;;  %v165_v32 = vmul.f32 %v162_v5, %v148_v13 }
  0xb3   :  { %v170_v43 = vadd.f32 %v166_v31, %v160_v39  ;;  %v169_v44 = vadd.f32 %v165_v32, %v159_v40 }
  0xb4   :  { %v174_v33 = vpop.permute.xlu1 %173  ;;  %v172_v34 = vpop.permute.xlu0 %171 }
  0xb5   :  { %v190_v37 = vmul.f32 %v188_v24, %v174_v33  ;;  %v189_v38 = vmul.f32 %v188_v24, %v172_v34 }
  0xb7   :  { %v194_v41 = vadd.f32 %v190_v37, %v168_v35  ;;  %v193_v42 = vadd.f32 %v189_v38, %v167_v36  ;;  %v238_v36 = vstv %s555_s12 }
  0xb8   :  { %v178_v45 = vpop.permute.xlu1 %177  ;;  %v176_v46 = vpop.permute.xlu0 %175 }
  0xb9   :  { %v192_v47 = vmul.f32 %v188_v24, %v178_v45  ;;  %v191_v48 = vmul.f32 %v188_v24, %v176_v46  ;;  %v204_v49 = vadd.f32 %v200_v25, %v194_v41  ;;  %v203_v50 = vadd.f32 %v199_v26, %v193_v42 }
  0xba   :  { %v244_v41 = vstv %s556_s13  ;;  %v266_v42 = vstv %s557_s14 }
  0xbb   :  { %v196_v53 = vadd.f32 %v192_v47, %v170_v43  ;;  %v195_v54 = vadd.f32 %v191_v48, %v169_v44 }
  0xbc   :  { %v182_v56 = vpop.permute.xlu1 %181  ;;  %v180_v20 = vpop.permute.xlu0 %179 }
  0xbd   :  { %v210_v57 = vmul.f32 %v208_v52, %v182_v56  ;;  %v209_v21 = vmul.f32 %v208_v52, %v180_v20  ;;  %v206_v58 = vadd.f32 %v202_v17, %v196_v53  ;;  %v205_v59 = vadd.f32 %v201_v18, %v195_v54 }
  0xbe   :  { %v276_v17 = vstv %s558_s15 }
  0xbf   :  { %v214_v60 = vadd.f32 %v210_v57, %v204_v49  ;;  %v213_v61 = vadd.f32 %v209_v21, %v203_v50 }
  0xc0   :  { %v186_v62 = vpop.permute.xlu1 %185  ;;  %v184_v63 = vpop.permute.xlu0 %183 }
  0xc1   :  { %v728_v2 = vsel %vm54_vm2, %v214_v60, 0.0  ;;  %v217_v0 = vsel %vm54_vm2, %v213_v61, 0.0  ;;  %v212_v1 = vmul.f32 %v208_v52, %v186_v62  ;;  %v211_v3 = vmul.f32 %v208_v52, %v184_v63 }
  0xc2   :  { %295 = vrot.lane.b32.xlu0 %v217_v0, %s609_s28  ;;  %297 = vrot.lane.b32.xlu1 %v728_v2, %s609_s28  ;;  %v221_v5 = vrot.slane %v217_v0, 7  ;;  %v222_v6 = vrot.slane %v728_v2, 7  ;;  %v230_v7 = vrot.slane %v728_v2, 1  ;;  %v229_v9 = vrot.slane %v217_v0, 1 }
  0xc3   :  { %v216_v10 = vadd.f32 %v212_v1, %v206_v58  ;;  %v215_v11 = vadd.f32 %v211_v3, %v205_v59  ;;  %v239_v39 = vmul.f32 %v238_v36, %v217_v0  ;;  %v240_v40 = vmul.f32 %v238_v36, %v728_v2 }
  0xc4   :  { %v745_v12 = vsel %vm63_vm0, %v221_v5, %v222_v6  ;;  %v749_v13 = vsel %vm72_vm1, %v229_v9, %v230_v7  ;;  %v286_v61 = vstv %s559_s16  ;;  %v312_v1 = vstv %s560_s17 }
  0xc5   :  { %v220_v14 = vsel %vm734_vm4, %v216_v10, 0.0  ;;  %v219_v15 = vsel %vm54_vm2, %v215_v11, 0.0  ;;  %v245_v46 = vadd.f32 %v244_v41, %v239_v39  ;;  %v246_v48 = vadd.f32 %v244_v41, %v240_v40 }
  0xc6   :  { %299 = vrot.lane.b32.xlu0 %v219_v15, %s609_s28  ;;  %301 = vrot.lane.b32.xlu1 %v220_v14, %s609_s28  ;;  %v224_v16 = vrot.slane %v220_v14, 7  ;;  %v223_v19 = vrot.slane %v219_v15, 7  ;;  %v231_v22 = vrot.slane %v219_v15, 1  ;;  %v232_v23 = vrot.slane %v220_v14, 1 }
  0xc7   :  { %v242_v44 = vmul.f32 %v238_v36, %v220_v14  ;;  %v241_v45 = vmul.f32 %v238_v36, %v219_v15  ;;  %v278_v52 = vmul.f32 %v276_v17, %v745_v12  ;;  %v322_v11 = vstv %s561_s18 }
  0xc8   :  { %v228_v24 = vsel %vm63_vm0, %v224_v16, %v221_v5  ;;  %v761_v25 = vsel %vm63_vm0, %v223_v19, %v224_v16  ;;  %v765_v26 = vsel %vm63_vm0, %v222_v6, %v223_v19  ;;  %v769_v27 = vsel %vm72_vm1, %v230_v7, %v231_v22 }
  0xc9   :  { %v776_v28 = vsel %vm72_vm1, %v232_v23, %v229_v9  ;;  %v780_v29 = vsel %vm72_vm1, %v231_v22, %v232_v23  ;;  %v277_v50 = vmul.f32 %v276_v17, %v228_v24  ;;  %v248_v55 = vadd.f32 %v244_v41, %v242_v44 }
  0xca   :  { %303 = vrot.lane.b32.xlu0 %v217_v0, %s610_s0  ;;  %305 = vrot.lane.b32.xlu1 %v728_v2, %s610_s0  ;;  %v247_v20 = vadd.f32 %v244_v41, %v241_v45  ;;  %v280_v62 = vmul.f32 %v276_v17, %v761_v25  ;;  %v279_v63 = vmul.f32 %v276_v17, %v765_v26  ;;  %v348_v40 = vstv %s562_s19 }
  0xce   :  { %307 = vrot.lane.b32.xlu0 %v219_v15, %s610_s0  ;;  %309 = vrot.lane.b32.xlu1 %v220_v14, %s610_s0 }
  0xd2   :  { %249 = vrot.lane.b32.xlu0 %v228_v24, %s609_s28  ;;  %251 = vrot.lane.b32.xlu1 %v745_v12, %s609_s28 }
  0xd6   :  { %255 = vrot.lane.b32.xlu1 %v761_v25, %s609_s28  ;;  %253 = vrot.lane.b32.xlu0 %v765_v26, %s609_s28 }
  0xda   :  { %259 = vrot.lane.b32.xlu1 %v745_v12, %s610_s0  ;;  %257 = vrot.lane.b32.xlu0 %v228_v24, %s610_s0 }
  0xde   :  { %263 = vrot.lane.b32.xlu1 %v761_v25, %s610_s0  ;;  %261 = vrot.lane.b32.xlu0 %v765_v26, %s610_s0 }
  0xe2   :  { %333 = vrot.lane.b32.xlu1 %v769_v27, %s609_s28  ;;  %331 = vrot.lane.b32.xlu0 %v749_v13, %s609_s28 }
  0xe6   :  { %337 = vrot.lane.b32.xlu1 %v776_v28, %s609_s28  ;;  %335 = vrot.lane.b32.xlu0 %v780_v29, %s609_s28 }
  0xea   :  { %341 = vrot.lane.b32.xlu1 %v769_v27, %s610_s0  ;;  %339 = vrot.lane.b32.xlu0 %v749_v13, %s610_s0 }
  0xee   :  { %345 = vrot.lane.b32.xlu1 %v776_v28, %s610_s0  ;;  %343 = vrot.lane.b32.xlu0 %v780_v29, %s610_s0 }
 0x134   :  { %v296_v30 = vpop.permute.xlu0 %295  ;;  %v298_v31 = vpop.permute.xlu1 %297 }
 0x135   :  { %v313_v12 = vmul.f32 %v312_v1, %v296_v30  ;;  %v314_v14 = vmul.f32 %v312_v1, %v298_v31  ;;  %v358_v30 = vstv %s563_s20 }
 0x138   :  { %v814_v32 = vpop.permute.xlu0 %299  ;;  %v816_v33 = vpop.permute.xlu1 %301 }
 0x139   :  { %v315_v41 = vmul.f32 %v312_v1, %v814_v32  ;;  %v359_v32 = vmul.f32 %v358_v30, %v749_v13 }
 0x13c   :  { %v304_v34 = vpop.permute.xlu0 %303  ;;  %v306_v35 = vpop.permute.xlu1 %305 }
 0x13d   :  { %v323_v36 = vmul.f32 %v322_v11, %v304_v34  ;;  %v324_v39 = vmul.f32 %v322_v11, %v306_v35 }
 0x140   :  { %v818_v37 = vpop.permute.xlu0 %307  ;;  %v820_v38 = vpop.permute.xlu1 %309 }
 0x141   :  { %v325_v34 = vmul.f32 %v322_v11, %v818_v37  ;;  %v326_v35 = vmul.f32 %v322_v11, %v820_v38  ;;  %v361_v37 = vmul.f32 %v358_v30, %v780_v29 }
 0x144   :  { %v250_v18 = vpop.permute.xlu0 %249  ;;  %v252_v43 = vpop.permute.xlu1 %251 }
 0x145   :  { %v267_v47 = vmul.f32 %v266_v42, %v250_v18  ;;  %v268_v49 = vmul.f32 %v266_v42, %v252_v43 }
 0x147   :  { %v271_v53 = vadd.f32 %v267_v47, %v245_v46  ;;  %v272_v54 = vadd.f32 %v268_v49, %v246_v48 }
 0x148   :  { %v256_v56 = vpop.permute.xlu1 %255  ;;  %v254_v57 = vpop.permute.xlu0 %253 }
 0x149   :  { %v270_v21 = vmul.f32 %v266_v42, %v256_v56  ;;  %v269_v58 = vmul.f32 %v266_v42, %v254_v57  ;;  %v282_v59 = vadd.f32 %v278_v52, %v272_v54  ;;  %v281_v60 = vadd.f32 %v277_v50, %v271_v53 }
 0x14a   :  { %v316_v42 = vmul.f32 %v312_v1, %v816_v33  ;;  %v360_v50 = vmul.f32 %v358_v30, %v769_v27 }
 0x14b   :  { %v274_v2 = vadd.f32 %v270_v21, %v248_v55  ;;  %v273_v0 = vadd.f32 %v269_v58, %v247_v20 }
 0x14c   :  { %v260_v3 = vpop.permute.xlu1 %259  ;;  %v258_v5 = vpop.permute.xlu0 %257 }
 0x14d   :  { %v288_v6 = vmul.f32 %v286_v61, %v260_v3  ;;  %v287_v7 = vmul.f32 %v286_v61, %v258_v5  ;;  %v284_v9 = vadd.f32 %v280_v62, %v274_v2  ;;  %v283_v10 = vadd.f32 %v279_v63, %v273_v0 }
 0x14f   :  { %v292_v15 = vadd.f32 %v288_v6, %v282_v59  ;;  %v291_v16 = vadd.f32 %v287_v7, %v281_v60  ;;  %v368_v59 = vstv %s564_s1  ;;  %v362_v60 = vmul.f32 %v358_v30, %v776_v28 }
 0x150   :  { %v264_v19 = vpop.permute.xlu1 %263  ;;  %v262_v22 = vpop.permute.xlu0 %261 }
 0x151   :  { %v318_v23 = vadd.f32 %v314_v14, %v292_v15  ;;  %v317_v24 = vadd.f32 %v313_v12, %v291_v16  ;;  %v290_v25 = vmul.f32 %v286_v61, %v264_v19  ;;  %v289_v26 = vmul.f32 %v286_v61, %v262_v22 }
 0x153   :  { %v294_v17 = vadd.f32 %v290_v25, %v284_v9  ;;  %v293_v18 = vadd.f32 %v289_v26, %v283_v10  ;;  %v328_v43 = vadd.f32 %v324_v39, %v318_v23  ;;  %v327_v44 = vadd.f32 %v323_v36, %v317_v24 }
 0x154   :  { %v334_v31 = vpop.permute.xlu1 %333  ;;  %v332_v45 = vpop.permute.xlu0 %331 }
 0x155   :  { %v320_v46 = vadd.f32 %v316_v42, %v294_v17  ;;  %v319_v47 = vadd.f32 %v315_v41, %v293_v18  ;;  %v350_v48 = vmul.f32 %v348_v40, %v334_v31  ;;  %v349_v49 = vmul.f32 %v348_v40, %v332_v45 }
 0x156   :  { %v398_v45 = vstv %s565_s2 }
 0x157   :  { %v354_v33 = vadd.f32 %v350_v48, %v328_v43  ;;  %v353_v52 = vadd.f32 %v349_v49, %v327_v44  ;;  %v330_v53 = vadd.f32 %v326_v35, %v320_v46  ;;  %v329_v56 = vadd.f32 %v325_v34, %v319_v47 }
 0x158   :  { %v338_v54 = vpop.permute.xlu1 %337  ;;  %v336_v55 = vpop.permute.xlu0 %335  ;;  %v404_v34 = vstv %s566_s21  ;;  %v426_v35 = vstv %s567_s22 }
 0x159   :  { %v352_v20 = vmul.f32 %v348_v40, %v338_v54  ;;  %v351_v57 = vmul.f32 %v348_v40, %v336_v55  ;;  %v364_v21 = vadd.f32 %v360_v50, %v354_v33  ;;  %v363_v58 = vadd.f32 %v359_v32, %v353_v52 }
 0x15a   :  { %v436_v50 = vstv %s568_s23 }
 0x15b   :  { %v356_v38 = vadd.f32 %v352_v20, %v330_v53  ;;  %v355_v61 = vadd.f32 %v351_v57, %v329_v56 }
 0x15c   :  { %v342_v27 = vpop.permute.xlu1 %341  ;;  %v340_v62 = vpop.permute.xlu0 %339 }
 0x15d   :  { %v370_v13 = vmul.f32 %v368_v59, %v342_v27  ;;  %v369_v63 = vmul.f32 %v368_v59, %v340_v62  ;;  %v366_v2 = vadd.f32 %v362_v60, %v356_v38  ;;  %v365_v0 = vadd.f32 %v361_v37, %v355_v61 }
 0x15f   :  { %v374_v1 = vadd.f32 %v370_v13, %v364_v21  ;;  %v373_v3 = vadd.f32 %v369_v63, %v363_v58 }
 0x160   :  { %v346_v5 = vpop.permute.xlu1 %345  ;;  %v344_v6 = vpop.permute.xlu0 %343 }
 0x161   :  { %v378_v7 = vsel %vm54_vm2, %v374_v1, 0.0  ;;  %v377_v28 = vsel %vm54_vm2, %v373_v3, 0.0  ;;  %v372_v9 = vmul.f32 %v368_v59, %v346_v5  ;;  %v371_v29 = vmul.f32 %v368_v59, %v344_v6 }
 0x162   :  { %457 = vrot.lane.b32.xlu1 %v378_v7, %s609_s28  ;;  %455 = vrot.lane.b32.xlu0 %v377_v28, %s609_s28  ;;  %v381_v10 = vrot.slane %v377_v28, 7  ;;  %v382_v11 = vrot.slane %v378_v7, 7  ;;  %v389_v12 = vrot.slane %v377_v28, 1  ;;  %v390_v14 = vrot.slane %v378_v7, 1 }
 0x163   :  { %v376_v15 = vadd.f32 %v372_v9, %v366_v2  ;;  %v375_v16 = vadd.f32 %v371_v29, %v365_v0  ;;  %v400_v48 = vmul.f32 %v398_v45, %v378_v7  ;;  %v399_v49 = vmul.f32 %v398_v45, %v377_v28 }
 0x164   :  { %v842_v19 = vsel %vm63_vm0, %v381_v10, %v382_v11  ;;  %v846_v22 = vsel %vm72_vm1, %v389_v12, %v390_v14  ;;  %v446_v2 = vstv %s569_s24  ;;  %v472_v6 = vstv %s570_s25 }
 0x165   :  { %v380_v23 = vsel %vm734_vm4, %v376_v15, 0.0  ;;  %v379_v24 = vsel %vm54_vm2, %v375_v16, 0.0  ;;  %v406_v54 = vadd.f32 %v404_v34, %v400_v48  ;;  %v405_v56 = vadd.f32 %v404_v34, %v399_v49 }
 0x166   :  { %461 = vrot.lane.b32.xlu1 %v380_v23, %s609_s28  ;;  %459 = vrot.lane.b32.xlu0 %v379_v24, %s609_s28  ;;  %v384_v25 = vrot.slane %v380_v23, 7  ;;  %v383_v26 = vrot.slane %v379_v24, 7  ;;  %v391_v36 = vrot.slane %v379_v24, 1  ;;  %v392_v39 = vrot.slane %v380_v23, 1 }
 0x167   :  { %v401_v52 = vmul.f32 %v398_v45, %v379_v24  ;;  %v402_v53 = vmul.f32 %v398_v45, %v380_v23  ;;  %v438_v57 = vmul.f32 %v436_v50, %v842_v19 }
 0x168   :  { %v388_v40 = vsel %vm63_vm0, %v384_v25, %v381_v10  ;;  %v858_v41 = vsel %vm63_vm0, %v382_v11, %v383_v26  ;;  %v862_v4 = vsel %vm63_vm0, %v383_v26, %v384_v25  ;;  %v866_v51 = vsel %vm72_vm1, %v390_v14, %v391_v36 }
 0x169   :  { %v872_v42 = vsel %vm72_vm1, %v391_v36, %v392_v39  ;;  %v876_v17 = vsel %vm72_vm1, %v392_v39, %v389_v12  ;;  %v437_v21 = vmul.f32 %v436_v50, %v388_v40  ;;  %v407_v60 = vadd.f32 %v404_v34, %v401_v52 }
 0x16a   :  { %465 = vrot.lane.b32.xlu1 %v378_v7, %s610_s0  ;;  %463 = vrot.lane.b32.xlu0 %v377_v28, %s610_s0  ;;  %v408_v38 = vadd.f32 %v404_v34, %v402_v53  ;;  %v439_v0 = vmul.f32 %v436_v50, %v858_v41  ;;  %v440_v1 = vmul.f32 %v436_v50, %v862_v4  ;;  %v482_v12 = vstv %s571_s26 }
 0x16e   :  { %469 = vrot.lane.b32.xlu1 %v380_v23, %s610_s0  ;;  %467 = vrot.lane.b32.xlu0 %v379_v24, %s610_s0 }
 0x172   :  { %411 = vrot.lane.b32.xlu1 %v842_v19, %s609_s28  ;;  %409 = vrot.lane.b32.xlu0 %v388_v40, %s609_s28 }
 0x176   :  { %413 = vrot.lane.b32.xlu0 %v858_v41, %s609_s28  ;;  %415 = vrot.lane.b32.xlu1 %v862_v4, %s609_s28 }
 0x17a   :  { %417 = vrot.lane.b32.xlu0 %v388_v40, %s610_s0  ;;  %419 = vrot.lane.b32.xlu1 %v842_v19, %s610_s0 }
 0x17e   :  { %421 = vrot.lane.b32.xlu0 %v858_v41, %s610_s0  ;;  %423 = vrot.lane.b32.xlu1 %v862_v4, %s610_s0  ;;  %v508_v4 = vstv %s572_s27 }
 0x182   :  { %491 = vrot.lane.b32.xlu0 %v846_v22, %s609_s28  ;;  %493 = vrot.lane.b32.xlu1 %v866_v51, %s609_s28 }
 0x186   :  { %495 = vrot.lane.b32.xlu0 %v872_v42, %s609_s28  ;;  %497 = vrot.lane.b32.xlu1 %v876_v17, %s609_s28  ;;  %s573_s28 = sld [smem:[#allocation2 + $0x19]] }
 0x18a   :  { %499 = vrot.lane.b32.xlu0 %v846_v22, %s610_s0  ;;  %501 = vrot.lane.b32.xlu1 %v866_v51, %s610_s0 }
 0x18e   :  { %503 = vrot.lane.b32.xlu0 %v872_v42, %s610_s0  ;;  %505 = vrot.lane.b32.xlu1 %v876_v17, %s610_s0  ;;  %s574_s0 = sld [smem:[#allocation2 + $0x1a]] }
 0x1d4   :  { %v458_v8 = vpop.permute.xlu1 %457  ;;  %v456_v18 = vpop.permute.xlu0 %455 }
 0x1d5   :  { %v474_v14 = vmul.f32 %v472_v6, %v458_v8  ;;  %v473_v15 = vmul.f32 %v472_v6, %v456_v18  ;;  %v518_v8 = vstv %s573_s28 }
 0x1d8   :  { %v910_v30 = vpop.permute.xlu1 %461  ;;  %v912_v31 = vpop.permute.xlu0 %459 }
 0x1d9   :  { %v476_v45 = vmul.f32 %v472_v6, %v910_v30  ;;  %v475_v48 = vmul.f32 %v472_v6, %v912_v31  ;;  %v520_v30 = vmul.f32 %v518_v8, %v866_v51 }
 0x1dc   :  { %v466_v43 = vpop.permute.xlu1 %465  ;;  %v464_v44 = vpop.permute.xlu0 %463 }
 0x1dd   :  { %v484_v40 = vmul.f32 %v482_v12, %v466_v43  ;;  %v483_v41 = vmul.f32 %v482_v12, %v464_v44 }
 0x1e0   :  { %v914_v46 = vpop.permute.xlu1 %469  ;;  %v916_v47 = vpop.permute.xlu0 %467 }
 0x1e1   :  { %v486_v43 = vmul.f32 %v482_v12, %v914_v46  ;;  %v485_v44 = vmul.f32 %v482_v12, %v916_v47  ;;  %v522_v46 = vmul.f32 %v518_v8, %v876_v17 }
 0x1e4   :  { %v412_v32 = vpop.permute.xlu1 %411  ;;  %v410_v33 = vpop.permute.xlu0 %409 }
 0x1e5   :  { %v428_v55 = vmul.f32 %v426_v35, %v412_v32  ;;  %v427_v20 = vmul.f32 %v426_v35, %v410_v33 }
 0x1e7   :  { %v432_v58 = vadd.f32 %v428_v55, %v406_v54  ;;  %v431_v59 = vadd.f32 %v427_v20, %v405_v56  ;;  %v519_v55 = vmul.f32 %v518_v8, %v846_v22 }
 0x1e8   :  { %v414_v37 = vpop.permute.xlu0 %413  ;;  %v416_v61 = vpop.permute.xlu1 %415 }
 0x1e9   :  { %v429_v27 = vmul.f32 %v426_v35, %v414_v37  ;;  %v430_v62 = vmul.f32 %v426_v35, %v416_v61  ;;  %v441_v13 = vadd.f32 %v437_v21, %v431_v59  ;;  %v442_v63 = vadd.f32 %v438_v57, %v432_v58 }
 0x1ea   :  { %v528_v61 = vstv %s574_s0 }
 0x1eb   :  { %v433_v3 = vadd.f32 %v429_v27, %v407_v60  ;;  %v434_v5 = vadd.f32 %v430_v62, %v408_v38  ;;  %v521_v27 = vmul.f32 %v518_v8, %v872_v42 }
 0x1ec   :  { %v418_v7 = vpop.permute.xlu0 %417  ;;  %v420_v28 = vpop.permute.xlu1 %419 }
 0x1ed   :  { %v447_v9 = vmul.f32 %v446_v2, %v418_v7  ;;  %v448_v29 = vmul.f32 %v446_v2, %v420_v28  ;;  %v443_v10 = vadd.f32 %v439_v0, %v433_v3  ;;  %v444_v11 = vadd.f32 %v440_v1, %v434_v5 }
 0x1ef   :  { %v451_v16 = vadd.f32 %v447_v9, %v441_v13  ;;  %v452_v19 = vadd.f32 %v448_v29, %v442_v63 }
 0x1f0   :  { %v422_v23 = vpop.permute.xlu0 %421  ;;  %v424_v24 = vpop.permute.xlu1 %423 }
 0x1f1   :  { %v477_v25 = vadd.f32 %v473_v15, %v451_v16  ;;  %v478_v26 = vadd.f32 %v474_v14, %v452_v19  ;;  %v449_v36 = vmul.f32 %v446_v2, %v422_v23  ;;  %v450_v39 = vmul.f32 %v446_v2, %v424_v24 }
 0x1f3   :  { %v453_v49 = vadd.f32 %v449_v36, %v443_v10  ;;  %v454_v34 = vadd.f32 %v450_v39, %v444_v11  ;;  %v487_v18 = vadd.f32 %v483_v41, %v477_v25  ;;  %v488_v50 = vadd.f32 %v484_v40, %v478_v26 }
 0x1f4   :  { %v492_v35 = vpop.permute.xlu0 %491  ;;  %v494_v32 = vpop.permute.xlu1 %493 }
 0x1f5   :  { %v479_v33 = vadd.f32 %v475_v48, %v453_v49  ;;  %v480_v52 = vadd.f32 %v476_v45, %v454_v34  ;;  %v509_v53 = vmul.f32 %v508_v4, %v492_v35  ;;  %v510_v54 = vmul.f32 %v508_v4, %v494_v32 }
 0x1f7   :  { %v513_v31 = vadd.f32 %v509_v53, %v487_v18  ;;  %v514_v56 = vadd.f32 %v510_v54, %v488_v50  ;;  %v489_v57 = vadd.f32 %v485_v44, %v479_v33  ;;  %v490_v58 = vadd.f32 %v486_v43, %v480_v52 }
 0x1f8   :  { %v496_v20 = vpop.permute.xlu0 %495  ;;  %v498_v21 = vpop.permute.xlu1 %497 }
 0x1f9   :  { %v511_v59 = vmul.f32 %v508_v4, %v496_v20  ;;  %v512_v60 = vmul.f32 %v508_v4, %v498_v21  ;;  %v523_v37 = vadd.f32 %v519_v55, %v513_v31  ;;  %v524_v38 = vadd.f32 %v520_v30, %v514_v56 }
 0x1fb   :  { %v515_v47 = vadd.f32 %v511_v59, %v489_v57  ;;  %v516_v62 = vadd.f32 %v512_v60, %v490_v58 }
 0x1fc   :  { %v500_v22 = vpop.permute.xlu0 %499  ;;  %v502_v13 = vpop.permute.xlu1 %501 }
 0x1fd   :  { %v529_v51 = vmul.f32 %v528_v61, %v500_v22  ;;  %v530_v63 = vmul.f32 %v528_v61, %v502_v13  ;;  %v525_v2 = vadd.f32 %v521_v27, %v515_v47  ;;  %v526_v0 = vadd.f32 %v522_v46, %v516_v62 }
 0x1ff   :  { %v533_v1 = vadd.f32 %v529_v51, %v523_v37  ;;  %v534_v3 = vadd.f32 %v530_v63, %v524_v38 }
 0x200   :  { %v504_v5 = vpop.permute.xlu0 %503  ;;  %v506_v6 = vpop.permute.xlu1 %505 }
 0x201   :  { %537 = vst [vmem:[%s944_s3] sm:$0xff] %v533_v1  ;;  %538 = vst [vmem:[%s944_s3 + $0x8] sm:$0xff] %v534_v3  ;;  %v531_v42 = vmul.f32 %v528_v61, %v504_v5  ;;  %v532_v17 = vmul.f32 %v528_v61, %v506_v6 }
 0x203   :  { %v535_v7 = vadd.f32 %v531_v42, %v525_v2  ;;  %v536_v28 = vadd.f32 %v532_v17, %v526_v0 }
 0x205   :  { %539 = vst [vmem:[%s944_s3 + $0x10] sm:$0xff] %v535_v7  ;;  %540 = vst [vmem:[%s944_s3 + $0x18] sm:$0xff] %v536_v28 }
 0x206   :  { %545 = vsyncpa [#allocation3], 1 }
 0x207   :  { %546 = vsyncpa [#allocation5], 1 }

</bundles_post_ra>
